<compile_context>
chip_gen: v6e
topology: v6e:2x2x1
jax: 0.10.0
libtpu: 0.0.40
codegen_flags: <defaults>
</compile_context>

<pallas_src>
import jax
import jax.numpy as jnp
from jax.experimental import pallas as pl
from jax.experimental.pallas import tpu as pltpu

OUT_CHANNELS = 128


def _lraspp_kernel(w_ref, x_ref, b_ref, o_ref):
    # w_ref: (C_out, C_in)   BN-scale-folded conv weight (resident across grid)
    # x_ref: (C_in, tile)    spatial tile of one image, NCHW-native layout
    # b_ref: (C_out, 1)      folded BN bias
    # o_ref: (C_out, tile)   output tile (lane-dense, unmasked stores)
    acc = jnp.dot(w_ref[...], x_ref[...], preferred_element_type=jnp.float32)
    o_ref[...] = jnp.maximum(acc + b_ref[...], 0.0).astype(o_ref.dtype)


def lraspp_forward(x_nchw, weight, gamma, beta, run_mean, run_var, eps=1e-5,
                   max_tile=1024):
    """x_nchw: (N, C_in, H, W) float32. Returns (N, 128, H, W) float32."""
    N, C_in, H, W = x_nchw.shape
    C_out = weight.shape[0]
    assert weight.shape == (C_out, C_in)
    S = H * W

    # Fold BN (eval / running-stats mode) into the conv weight and a bias:
    #   y = relu( (W * s) @ x + (beta - mean * s) ),  s = gamma / sqrt(var + eps)
    s = gamma / jnp.sqrt(run_var + eps)                        # (C_out,)
    w_folded = (weight * s[:, None]).astype(jnp.float32)       # (C_out, C_in)
    bias = (beta - run_mean * s).reshape(C_out, 1).astype(jnp.float32)

    # NCHW is already (N, C_in, H*W)-contiguous: pure reshape, no transpose.
    x3 = x_nchw.reshape(N, C_in, S).astype(jnp.float32)

    # Spatial tile: use the full spatial extent when it fits in one tile
    # (no padding, block == full dim satisfies the lane constraint), otherwise
    # a large 128-aligned tile.
    if S <= max_tile:
        tile, S_pad = S, S
    else:
        tile = (max_tile // 128) * 128
        S_pad = pl.cdiv(S, tile) * tile

    if S_pad != S:
        # Only hit when H*W is not a multiple of the tile; padded columns are
        # sliced away below, so they never reach the final output.
        x3 = jnp.pad(x3, ((0, 0), (0, 0), (0, S_pad - S)))

    grid = (N, S_pad // tile)

    # Advisory cost hint for XLA scheduling around this memory-bound call.
    cost = pl.CostEstimate(
        flops=2 * N * S * C_in * C_out,
        transcendentals=0,
        bytes_accessed=4 * (N * S * (C_in + C_out) + C_out * C_in + C_out),
    )

    out = pl.pallas_call(
        _lraspp_kernel,
        out_shape=jax.ShapeDtypeStruct((N, C_out, S_pad), jnp.float32),
        grid_spec=pltpu.PrefetchScalarGridSpec(
            num_scalar_prefetch=0,
            grid=grid,
            in_specs=[
                pl.BlockSpec((C_out, C_in), lambda n, j: (0, 0)),
                pl.BlockSpec((None, C_in, tile), lambda n, j: (n, 0, j)),
                pl.BlockSpec((C_out, 1), lambda n, j: (0, 0)),
            ],
            out_specs=pl.BlockSpec((None, C_out, tile), lambda n, j: (n, 0, j)),
        ),
        compiler_params=pltpu.CompilerParams(
            dimension_semantics=("parallel", "parallel")),
        cost_estimate=cost,
    )(w_folded, x3, bias)

    if S_pad != S:
        out = out[:, :, :S]
    # (N, C_out, H*W) -> (N, C_out, H, W): pure reshape, no transpose.
    return out.reshape(N, C_out, H, W)


def _reference(x_nchw, weight, gamma, beta, run_mean, run_var, eps=1e-5):
    # Pure-JAX reference of the same semantics (1x1 conv + eval BN + ReLU).
    conv = jnp.einsum("nchw,oc->nohw", x_nchw, weight)
    s = (gamma / jnp.sqrt(run_var + eps)).reshape(1, -1, 1, 1)
    b = (beta - run_mean * gamma / jnp.sqrt(run_var + eps)).reshape(1, -1, 1, 1)
    return jnp.maximum(conv * s + b, 0.0)


if __name__ == "__main__":
    key = jax.random.PRNGKey(0)
    k1, k2, k3, k4, k5, k6 = jax.random.split(key, 6)

    N, C_in, H, W = 2, 4, 16, 16
    x = jax.random.normal(k1, (N, C_in, H, W), dtype=jnp.float32)

    # Deterministic synthetic parameters (shapes from the module __init__).
    weight = jax.random.normal(k2, (OUT_CHANNELS, C_in), dtype=jnp.float32) * 0.1
    gamma = 1.0 + 0.1 * jax.random.normal(k3, (OUT_CHANNELS,), dtype=jnp.float32)
    beta = 0.1 * jax.random.normal(k4, (OUT_CHANNELS,), dtype=jnp.float32)
    run_mean = 0.1 * jax.random.normal(k5, (OUT_CHANNELS,), dtype=jnp.float32)
    run_var = jnp.abs(jax.random.normal(k6, (OUT_CHANNELS,), dtype=jnp.float32)) + 0.5
    # TODO(synk): PyTorch BatchNorm2d in training mode would use batch stats;
    # here we use inference (running-stats) semantics with synthetic stats.

    out = lraspp_forward(x, weight, gamma, beta, run_mean, run_var)
    out = jax.block_until_ready(out)

    ref = _reference(x, weight, gamma, beta, run_mean, run_var)
    assert out.shape == (N, OUT_CHANNELS, H, W), out.shape
    assert jnp.allclose(out, ref, atol=1e-4, rtol=1e-4), float(
        jnp.max(jnp.abs(out - ref)))

    print("KERNEL_OK")
</pallas_src>

<mosaic_0001>
module attributes {stable_mosaic.version = 11 : i64} {
  func.func @_lraspp_kernel(%arg0: i32, %arg1: i32, %arg2: memref<128x4xf32, #tpu.memory_space<vmem>>, %arg3: memref<1x4x256xf32, #tpu.memory_space<vmem>>, %arg4: memref<128x1xf32, #tpu.memory_space<vmem>>, %arg5: memref<1x128x256xf32, #tpu.memory_space<vmem>>) attributes {dimension_semantics = [#tpu.dimension_semantics<parallel>, #tpu.dimension_semantics<parallel>], iteration_bounds = array<i64: 2, 1>, scalar_prefetch = 0 : i64, scratch_operands = 0 : i64, tpu.core_type = #tpu.core_type<tc>, window_params = [{pipeline_mode = #tpu.pipeline_mode<synchronous>, transform_indices = @transform_0, window_bounds = array<i64: 128, 4>}, {transform_indices = @transform_1, window_bounds = array<i64: 1, 4, 256>}, {pipeline_mode = #tpu.pipeline_mode<synchronous>, transform_indices = @transform_2, window_bounds = array<i64: 128, 1>}, {transform_indices = @transform_3, window_bounds = array<i64: 1, 128, 256>}]} {
    %c0 = arith.constant 0 : index
    %c0_0 = arith.constant 0 : index
    %0 = vector.load %arg2[%c0, %c0_0] : memref<128x4xf32, #tpu.memory_space<vmem>>, vector<128x4xf32>
    %c0_1 = arith.constant 0 : index
    %c0_2 = arith.constant 0 : index
    %c0_3 = arith.constant 0 : index
    %1 = vector.load %arg3[%c0_1, %c0_2, %c0_3] : memref<1x4x256xf32, #tpu.memory_space<vmem>>, vector<1x4x256xf32>
    %2 = vector.shape_cast %1 : vector<1x4x256xf32> to vector<4x256xf32>
    %cst = arith.constant dense<0.000000e+00> : vector<128x256xf32>
    %3 = tpu.matmul %0, %2, %cst {dimension_numbers = #tpu.dot_dimension_numbers<[1], [0], [0], [1], [0, 0, 1, 1], [], []>} : vector<128x4xf32>, vector<4x256xf32>, vector<128x256xf32> -> vector<128x256xf32>
    %c0_4 = arith.constant 0 : index
    %c0_5 = arith.constant 0 : index
    %4 = vector.load %arg4[%c0_4, %c0_5] : memref<128x1xf32, #tpu.memory_space<vmem>>, vector<128x1xf32>
    %5 = vector.broadcast %4 : vector<128x1xf32> to vector<128x256xf32>
    %6 = arith.addf %3, %5 : vector<128x256xf32>
    %cst_6 = arith.constant 0.000000e+00 : f32
    %7 = vector.broadcast %cst_6 : f32 to vector<128x256xf32>
    %8 = arith.maximumf %6, %7 : vector<128x256xf32>
    %c0_7 = arith.constant 0 : index
    %c0_8 = arith.constant 0 : index
    %c0_9 = arith.constant 0 : index
    %9 = vector.load %arg5[%c0_7, %c0_8, %c0_9] : memref<1x128x256xf32, #tpu.memory_space<vmem>>, vector<1x128x256xf32>
    %10 = vector.shape_cast %9 : vector<1x128x256xf32> to vector<128x256xf32>
    %11 = vector.shape_cast %8 : vector<128x256xf32> to vector<1x128x256xf32>
    tpu.vector_store %arg5[%c0_7, %c0_8, %c0_9], %11 {strides = array<i32>} : memref<1x128x256xf32, #tpu.memory_space<vmem>>, vector<1x128x256xf32>,
    return
  }
  func.func @transform_0(%arg0: i32, %arg1: i32) -> (i32, i32) {
    %c0_i32 = arith.constant 0 : i32
    %c0_i32_0 = arith.constant 0 : i32
    %c0_i32_1 = arith.constant 0 : i32
    return %c0_i32, %c0_i32_0 : i32, i32
  }
  func.func @transform_1(%arg0: i32, %arg1: i32) -> (i32, i32, i32) {
    %c0_i32 = arith.constant 0 : i32
    %c0_i32_0 = arith.constant 0 : i32
    return %arg0, %c0_i32, %arg1 : i32, i32, i32
  }
  func.func @transform_2(%arg0: i32, %arg1: i32) -> (i32, i32) {
    %c0_i32 = arith.constant 0 : i32
    %c0_i32_0 = arith.constant 0 : i32
    %c0_i32_1 = arith.constant 0 : i32
    return %c0_i32, %c0_i32_0 : i32, i32
  }
  func.func @transform_3(%arg0: i32, %arg1: i32) -> (i32, i32, i32) {
    %c0_i32 = arith.constant 0 : i32
    %c0_i32_0 = arith.constant 0 : i32
    return %arg0, %c0_i32, %arg1 : i32, i32, i32
  }
}

</mosaic_0001>

<bundles_post_ra>
// kernel: tpu_custom_call.1
= control target key start
LH: loop header
LB: loop body
LE: loop exit
PB: predicated region body
PF: predicated region fallthrough
CT: control target
= control target key end

     0   :  { %8 = vsyncpa [#allocation3], 0  ;;  %s1190_s0 = inlined_call_operand.vmem [shape: f32[128,4], index: 0, kind: input, shape index: {}]   ;;  %s1191_s1 = inlined_call_operand.vmem [shape: f32[2,4,256], index: 1, kind: input, shape index: {}]   ;;  %s1192_s2 = inlined_call_operand.vmem [shape: f32[128,1], index: 2, kind: input, shape index: {}]   ;;  %s1193_s3 = inlined_call_operand.hbm [shape: f32[2,128,256], index: 3, kind: output, shape index: {}]  }
   0x1   :  { %10 = vsyncpa [#allocation3 + $0x1], 0  ;;  %s889_s12 = smov 0   ;;  %s891_s13 = smov 0  }
   0x2   :  { %s893_s14 = smov 0   ;;  %s895_s15 = smov 0  }
   0x3   :  { %s897_s16 = smov 0   ;;  %s899_s17 = smov 0  }
   0x4 LB: > { %s689_s18 = sadd.s32 4294967295, %s862_s17   ;;  %s690_s19 = sadd.s32 4294967294, %s862_s17   ;;  %s862_s17 = sphi %s899_s17, %s16_s17   ;;  %s858_s16 = sphi %s897_s16, %s1200_s16   ;;  %s854_s15 = sphi %s895_s15, %s1199_s15   ;;  %s850_s14 = sphi %s893_s14, %s1198_s14   ;;  %s846_s13 = sphi %s891_s13, %s1197_s13   ;;  %s842_s12 = sphi %s889_s12, %s1196_s12  }
   0x5   : > { %s28_s20 = sadd.s32 1, %s858_s16  ;;  %s107_s21 = sadd.s32 1, %s850_s14 }
   0x6   : > { %p30_p0 = scmp.ge.s32.totalorder %s28_s20, 2  ;;  %p117_p1 = scmp.ne.s32.totalorder %s850_s14, %s846_s13 }
   0x7   : > { %p118_p2 = scmp.eq.s32.totalorder %s689_s18, 1  ;;  %p123_p3 = scmp.ne.s32.totalorder %s846_s13, %s842_s12 }
   0x8   : > { %s1202_s20 = smov (%p30_p0, %s28_s20), 0  ;;  %p124_p5 = scmp.eq.s32.totalorder %s690_s19, 1 }
   0x9   : > { %p929_p4 = por %p118_p2, %p117_p1  ;;  %s102_s23 = ssub.s32 %s858_s16, %s1202_s20 }
   0xa   : > { %p693_p6 = scmp.ge.s32.totalorder %s862_s17, 1  ;;  %p105_p7 = scmp.eq.s32.totalorder %s102_s23, 0 }
   0xb   : > { %p936_p8 = por %p124_p5, %p123_p3  ;;  %p161_p9 = scmp.lt.s32.totalorder %s862_s17, 3 }
   0xc   : > { %s942_s25 = scalar_select %p105_p7, %s850_s14, %s107_s21  }
   0xd   : > { %p162_p10 = pnand %p693_p6, %p161_p9 }
   0xe   : > { %p190_p11 = scmp.lt.s32.totalorder (!%p162_p10), %s854_s15, 1  ;;  %s866_s9 = smov (!%p162_p10), [#allocation2]  }
   0xf   : > { %165 = sbr.rel (%p162_p10) target bundleno = 270 (0x10e), region = 32  ;;  %s790_s10 = sshll.u32 (!%p162_p10), %s866_s9, 4  ;;  %s791_s10 = int_to_ptr.vmem [resolvable:$false] %s790_s10 }
  0x10   : > { %s792_s11 = scalar_lea.vmem (!%p162_p10), %s791_s10, 8192 }
  0x14   : > { %v864_v0 = vmov 0.0   ;;  %s191_s26 = scalar_select %p190_p11, %s854_s15, 1  ;;  %v865_v1 = vmov 0   ;;  %v219_v2 = vld [vmem:[%s1192_s2 + $0x10] sm:$0xff]  ;;  %vm364_vm0 = vcmask 1043456   ;;  %v217_v4 = vld [vmem:[%s1192_s2] sm:$0xff] }
  0x15   : > { %433 = vmatprep.mubr.f32.mxu0 %v864_v0  ;;  %481 = vmatprep.mubr.f32.mxu1 %v864_v0  ;;  %v200_v6 = vld [vmem:[%s1190_s0] sm:$0xff]  ;;  %vm315_vm1 = vcmask 31744   ;;  %v220_v8 = vld [vmem:[%s1192_s2 + $0x18] sm:$0xff]  ;;  %v218_v9 = vld [vmem:[%s1192_s2 + $0x8] sm:$0xff] }
  0x16   : > { %784 = vset.pattern.permute.xlu1 %v865_v1  ;;  %783 = vset.pattern.permute.xlu0 %v865_v1  ;;  %s720_s27 = sshll.u32 %s191_s26, 3  ;;  %v208_v7 = vld [vmem:[%s1190_s0 + $0x40] sm:$0xff]  ;;  %v201_v10 = vld [vmem:[%s1190_s0 + $0x8] sm:$0xff]  ;;  %v202_v14 = vld [vmem:[%s1190_s0 + $0x10] sm:$0xff] }
  0x17   : > { %s197_s30 = scalar_lea.vmem %s1191_s1, %s720_s27  ;;  %245 = vperm.xlu1 %784, %v219_v2   ;;  %235 = vperm.xlu0 %783, %v217_v4   ;;  %v209_v11 = vld [vmem:[%s1190_s0 + $0x48] sm:$0xff]  ;;  %v221_v13 = vld [vmem:[%s1192_s2 + $0x20] sm:$0xff]  ;;  %v210_v15 = vld [vmem:[%s1190_s0 + $0x50] sm:$0xff]  ;;  %s186_s27 = sand.u32 1, %s846_s13  }
  0x18   : > { %v216_v3 = vld [vmem:[%s197_s30] sm:$0xff]  ;;  %v222_v12 = vld [vmem:[%s1192_s2 + $0x28] sm:$0xff]  ;;  %v224_v16 = vld [vmem:[%s1192_s2 + $0x38] sm:$0xff]  ;;  %s694_s28 = sshll.u32 %s186_s27, 8  ;;  %s721_s30 = sshll.u32 %s854_s15, 12 }
  0x19   : > { %v314_v5 = vcombine.high %v216_v3, %v216_v3  ;;  %v223_v17 = vld [vmem:[%s1192_s2 + $0x30] sm:$0xff]  ;;  %v203_v18 = vld [vmem:[%s1190_s0 + $0x18] sm:$0xff]  ;;  %v226_v20 = vld [vmem:[%s1192_s2 + $0x48] sm:$0xff]  ;;  %s1090_s29 = scalar_lea.vmem [#allocation2], %s694_s28  ;;  %s1135_s7 = scalar_lea.hbm %s1193_s3, %s721_s30 }
  0x1a   : > { %v211_v19 = vld [vmem:[%s1190_s0 + $0x58] sm:$0xff]  ;;  %v225_v21 = vld [vmem:[%s1192_s2 + $0x40] sm:$0xff]  ;;  %v227_v25 = vld [vmem:[%s1192_s2 + $0x50] sm:$0xff]  ;;  %s610_s4 = sshll.u32 %s1090_s29, 4  ;;  %s1145_s15 = scalar_lea.sflag [#allocation3], %s186_s27  ;;  %s1137_s4 = int_to_ptr.vmem [resolvable:$true] %s610_s4 }
  0x1b   : > { %697 = vmatprep.subr.msk.mxu0 %vm364_vm0, %v314_v5  ;;  %722 = vmatprep.subr.msk.mxu1 %vm364_vm0, %v314_v5  ;;  %v204_v22 = vld [vmem:[%s1190_s0 + $0x20] sm:$0xff]  ;;  %v228_v24 = vld [vmem:[%s1192_s2 + $0x58] sm:$0xff]  ;;  %v205_v26 = vld [vmem:[%s1190_s0 + $0x28] sm:$0xff]  ;;  %s786_s8 = scalar_lea.vmem %s1137_s4, 4096  ;;  %p793_p1 = scmp.lt.s32.totalorder %s1137_s4, %s791_s10 }
  0x1c   : > { %698 = vmatpush1.msk.msra.mxu0 %vm364_vm0, %v216_v3  ;;  %723 = vmatpush1.msk.msra.mxu1 %vm364_vm0, %v216_v3  ;;  %v212_v23 = vld [vmem:[%s1190_s0 + $0x60] sm:$0xff]  ;;  %v213_v27 = vld [vmem:[%s1190_s0 + $0x68] sm:$0xff]  ;;  %v206_v30 = vld [vmem:[%s1190_s0 + $0x30] sm:$0xff]  ;;  %p787_p12 = scmp.ne.s32.totalorder %s1137_s4, %s786_s8  ;;  %p794_p2 = scmp.lt.s32.totalorder %s792_s11, %s786_s8 }
  0x1d   : > { %699 = vmatmul.mubr.msk.f32.vlgmr.msra.gmra.mxu0 %vm315_vm1, %v200_v6  ;;  %707 = vmatmul.mubr.msk.f32.vlgmr.msra.gmra.mxu1 %vm315_vm1, %v208_v7  ;;  %v230_v28 = vld [vmem:[%s1192_s2 + $0x68] sm:$0xff]  ;;  %v229_v29 = vld [vmem:[%s1192_s2 + $0x60] sm:$0xff]  ;;  %v214_v31 = vld [vmem:[%s1190_s0 + $0x70] sm:$0xff] }
  0x1e   : > { %439 = vmatprep.mubr.f32.mxu0 %v864_v0  ;;  %487 = vmatprep.mubr.f32.mxu1 %v864_v0  ;;  %v232_v32 = vld [vmem:[%s1192_s2 + $0x78] sm:$0xff]  ;;  %v231_v33 = vld [vmem:[%s1192_s2 + $0x70] sm:$0xff]  ;;  %p788_p13 = pnand %p787_p12, %p929_p4  ;;  %p795_p3 = por %p794_p2, %p793_p1 }
  0x1f   : > { %250 = vperm.xlu1 %784, %v220_v8   ;;  %240 = vperm.xlu0 %783, %v218_v9   ;;  %v207_v34 = vld [vmem:[%s1190_s0 + $0x38] sm:$0xff] }
  0x20   : > { %v215_v35 = vld [vmem:[%s1190_s0 + $0x78] sm:$0xff]  ;;  %p789_p0 = pneg %p788_p13 }
  0x21   : > { %700 = vmatmul.mubr.msk.f32.gmra.mxu0 %vm315_vm1, %v201_v10  ;;  %708 = vmatmul.mubr.msk.f32.gmra.mxu1 %vm315_vm1, %v209_v11 }
  0x22   : > { %445 = vmatprep.mubr.f32.mxu0 %v864_v0  ;;  %493 = vmatprep.mubr.f32.mxu1 %v864_v0  ;;  %p796_p5 = pnand %p795_p3, %p789_p0 }
  0x23   : > { %260 = vperm.xlu1 %784, %v222_v12   ;;  %255 = vperm.xlu0 %783, %v221_v13  }
  0x25   : > { %701 = vmatmul.mubr.msk.f32.gmra.mxu0 %vm315_vm1, %v202_v14  ;;  %709 = vmatmul.mubr.msk.f32.gmra.mxu1 %vm315_vm1, %v210_v15 }
  0x26   : > { %451 = vmatprep.mubr.f32.mxu0 %v864_v0  ;;  %499 = vmatprep.mubr.f32.mxu1 %v864_v0 }
  0x27   : > { %270 = vperm.xlu1 %784, %v224_v16   ;;  %265 = vperm.xlu0 %783, %v223_v17  }
  0x29   : > { %702 = vmatmul.mubr.msk.f32.gmra.mxu0 %vm315_vm1, %v203_v18  ;;  %710 = vmatmul.mubr.msk.f32.gmra.mxu1 %vm315_vm1, %v211_v19 }
  0x2a   : > { %457 = vmatprep.mubr.f32.mxu0 %v864_v0  ;;  %505 = vmatprep.mubr.f32.mxu1 %v864_v0 }
  0x2b   : > { %280 = vperm.xlu1 %784, %v226_v20   ;;  %275 = vperm.xlu0 %783, %v225_v21  }
  0x2d   : > { %703 = vmatmul.mubr.msk.f32.gmra.mxu0 %vm315_vm1, %v204_v22  ;;  %711 = vmatmul.mubr.msk.f32.gmra.mxu1 %vm315_vm1, %v212_v23 }
  0x2e   : > { %463 = vmatprep.mubr.f32.mxu0 %v864_v0  ;;  %511 = vmatprep.mubr.f32.mxu1 %v864_v0 }
  0x2f   : > { %290 = vperm.xlu1 %784, %v228_v24   ;;  %285 = vperm.xlu0 %783, %v227_v25  }
  0x31   : > { %704 = vmatmul.mubr.msk.f32.gmra.mxu0 %vm315_vm1, %v205_v26  ;;  %712 = vmatmul.mubr.msk.f32.gmra.mxu1 %vm315_vm1, %v213_v27 }
  0x32   : > { %469 = vmatprep.mubr.f32.mxu0 %v864_v0  ;;  %517 = vmatprep.mubr.f32.mxu1 %v864_v0 }
  0x33   : > { %300 = vperm.xlu1 %784, %v230_v28   ;;  %295 = vperm.xlu0 %783, %v229_v29  }
  0x35   : > { %705 = vmatmul.mubr.msk.f32.gmra.mxu0 %vm315_vm1, %v206_v30  ;;  %713 = vmatmul.mubr.msk.f32.gmra.mxu1 %vm315_vm1, %v214_v31 }
  0x36   : > { %475 = vmatprep.mubr.f32.mxu0 %v864_v0  ;;  %523 = vmatprep.mubr.f32.mxu1 %v864_v0 }
  0x37   : > { %310 = vperm.xlu1 %784, %v232_v32   ;;  %305 = vperm.xlu0 %783, %v231_v33  }
  0x39   : > { %706 = vmatmul.mubr.msk.f32.gmra.mxu0 %vm315_vm1, %v207_v34  ;;  %714 = vmatmul.mubr.msk.f32.gmra.mxu1 %vm315_vm1, %v215_v35 }
  0x92   : > { %v236_v36 = vpop.permute.xlu0 %235  ;;  %v246_v37 = vpop.permute.xlu1 %245 }
  0x9a   : > { %v241_v38 = vpop.permute.xlu0 %240  ;;  %v1077_v39 = vpop.permute.xlu1 %250 }
  0x9e   : > { %v1079_v40 = vpop.permute.xlu0 %255  ;;  %v1081_v41 = vpop.permute.xlu1 %260 }
  0xa2   : > { %v1083_v42 = vpop.permute.xlu0 %265  ;;  %v1086_v43 = vpop.permute.xlu1 %270 }
  0xa6   : > { %v276_v44 = vpop.permute.xlu0 %275  ;;  %v281_v51 = vpop.permute.xlu1 %280 }
  0xaa   : > { %v286_v0 = vpop.permute.xlu0 %285  ;;  %v291_v13 = vpop.permute.xlu1 %290 }
  0xae   : > { %v296_v26 = vpop.permute.xlu0 %295 }
  0xdd   : > { %v435_v45 = vpop.f32.mrf.mxu0  ;;  %v483_v46 = vpop.f32.mrf.mxu1 }
  0xde   : > { %v436_v47 = vadd.f32 %v435_v45, %v236_v36  ;;  %v484_v48 = vadd.f32 %v483_v46, %v276_v44 }
  0xdf   : > { %v437_v49 = vpop.f32.mrf.mxu0  ;;  %v485_v50 = vpop.f32.mrf.mxu1 }
  0xe0   : > { %v530_v52 = vmax.f32 %v436_v47, 0.0  ;;  %v546_v53 = vmax.f32 %v484_v48, 0.0  ;;  %v438_v54 = vadd.f32 %v437_v49, %v236_v36  ;;  %v486_v55 = vadd.f32 %v485_v50, %v276_v44  ;;  %v301_v44 = vpop.permute.xlu1 %300 }
  0xe1   : > { %v441_v56 = vpop.f32.mrf.mxu0  ;;  %v489_v57 = vpop.f32.mrf.mxu1 }
  0xe2   : > { %562 = vst [vmem:[%s1090_s29] sm:$0xff] %v530_v52  ;;  %578 = vst [vmem:[%s1090_s29 + $0x80] sm:$0xff] %v546_v53  ;;  %v531_v58 = vmax.f32 %v438_v54, 0.0  ;;  %v547_v59 = vmax.f32 %v486_v55, 0.0  ;;  %v442_v60 = vadd.f32 %v441_v56, %v241_v38  ;;  %v490_v61 = vadd.f32 %v489_v57, %v281_v51  ;;  %v306_v56 = vpop.permute.xlu0 %305 }
  0xe3   : > { %v443_v62 = vpop.f32.mrf.mxu0  ;;  %v491_v63 = vpop.f32.mrf.mxu1 }
  0xe4   : > { %563 = vst [vmem:[%s1090_s29 + $0x8] sm:$0xff] %v531_v58  ;;  %579 = vst [vmem:[%s1090_s29 + $0x88] sm:$0xff] %v547_v59  ;;  %v532_v1 = vmax.f32 %v442_v60, 0.0  ;;  %v548_v2 = vmax.f32 %v490_v61, 0.0  ;;  %v444_v3 = vadd.f32 %v443_v62, %v241_v38  ;;  %v492_v4 = vadd.f32 %v491_v63, %v281_v51 }
  0xe5   : > { %v447_v5 = vpop.f32.mrf.mxu0  ;;  %v495_v6 = vpop.f32.mrf.mxu1 }
  0xe6   : > { %564 = vst [vmem:[%s1090_s29 + $0x10] sm:$0xff] %v532_v1  ;;  %580 = vst [vmem:[%s1090_s29 + $0x90] sm:$0xff] %v548_v2  ;;  %v533_v7 = vmax.f32 %v444_v3, 0.0  ;;  %v549_v8 = vmax.f32 %v492_v4, 0.0  ;;  %v448_v9 = vadd.f32 %v447_v5, %v246_v37  ;;  %v496_v10 = vadd.f32 %v495_v6, %v286_v0  ;;  %v311_v4 = vpop.permute.xlu1 %310 }
  0xe7   : > { %v449_v11 = vpop.f32.mrf.mxu0  ;;  %v497_v12 = vpop.f32.mrf.mxu1 }
  0xe8   : > { %565 = vst [vmem:[%s1090_s29 + $0x18] sm:$0xff] %v533_v7  ;;  %581 = vst [vmem:[%s1090_s29 + $0x98] sm:$0xff] %v549_v8  ;;  %v534_v14 = vmax.f32 %v448_v9, 0.0  ;;  %v550_v15 = vmax.f32 %v496_v10, 0.0  ;;  %v450_v16 = vadd.f32 %v449_v11, %v246_v37  ;;  %v498_v17 = vadd.f32 %v497_v12, %v286_v0 }
  0xe9   : > { %v453_v18 = vpop.f32.mrf.mxu0  ;;  %v501_v19 = vpop.f32.mrf.mxu1 }
  0xea   : > { %566 = vst [vmem:[%s1090_s29 + $0x20] sm:$0xff] %v534_v14  ;;  %582 = vst [vmem:[%s1090_s29 + $0xa0] sm:$0xff] %v550_v15  ;;  %v535_v20 = vmax.f32 %v450_v16, 0.0  ;;  %v551_v21 = vmax.f32 %v498_v17, 0.0  ;;  %v454_v22 = vadd.f32 %v453_v18, %v1077_v39  ;;  %v502_v23 = vadd.f32 %v501_v19, %v291_v13 }
  0xeb   : > { %v455_v24 = vpop.f32.mrf.mxu0  ;;  %v503_v25 = vpop.f32.mrf.mxu1 }
  0xec   : > { %567 = vst [vmem:[%s1090_s29 + $0x28] sm:$0xff] %v535_v20  ;;  %583 = vst [vmem:[%s1090_s29 + $0xa8] sm:$0xff] %v551_v21  ;;  %v536_v27 = vmax.f32 %v454_v22, 0.0  ;;  %v552_v28 = vmax.f32 %v502_v23, 0.0  ;;  %v456_v29 = vadd.f32 %v455_v24, %v1077_v39  ;;  %v504_v30 = vadd.f32 %v503_v25, %v291_v13 }
  0xed   : > { %v459_v31 = vpop.f32.mrf.mxu0  ;;  %v507_v32 = vpop.f32.mrf.mxu1 }
  0xee   : > { %568 = vst [vmem:[%s1090_s29 + $0x30] sm:$0xff] %v536_v27  ;;  %584 = vst [vmem:[%s1090_s29 + $0xb0] sm:$0xff] %v552_v28  ;;  %v537_v33 = vmax.f32 %v456_v29, 0.0  ;;  %v553_v34 = vmax.f32 %v504_v30, 0.0  ;;  %v460_v35 = vadd.f32 %v459_v31, %v1079_v40  ;;  %v508_v36 = vadd.f32 %v507_v32, %v296_v26 }
  0xef   : > { %v461_v37 = vpop.f32.mrf.mxu0  ;;  %v509_v38 = vpop.f32.mrf.mxu1 }
  0xf0   : > { %569 = vst [vmem:[%s1090_s29 + $0x38] sm:$0xff] %v537_v33  ;;  %585 = vst [vmem:[%s1090_s29 + $0xb8] sm:$0xff] %v553_v34  ;;  %v538_v45 = vmax.f32 %v460_v35, 0.0  ;;  %v554_v39 = vmax.f32 %v508_v36, 0.0  ;;  %v462_v46 = vadd.f32 %v461_v37, %v1079_v40  ;;  %v510_v47 = vadd.f32 %v509_v38, %v296_v26 }
  0xf1   : > { %v465_v48 = vpop.f32.mrf.mxu0  ;;  %v513_v49 = vpop.f32.mrf.mxu1 }
  0xf2   : > { %570 = vst [vmem:[%s1090_s29 + $0x40] sm:$0xff] %v538_v45  ;;  %586 = vst [vmem:[%s1090_s29 + $0xc0] sm:$0xff] %v554_v39  ;;  %v539_v50 = vmax.f32 %v462_v46, 0.0  ;;  %v555_v51 = vmax.f32 %v510_v47, 0.0  ;;  %v466_v52 = vadd.f32 %v465_v48, %v1081_v41  ;;  %v514_v53 = vadd.f32 %v513_v49, %v301_v44 }
  0xf3   : > { %v467_v54 = vpop.f32.mrf.mxu0  ;;  %v515_v55 = vpop.f32.mrf.mxu1 }
  0xf4   : > { %571 = vst [vmem:[%s1090_s29 + $0x48] sm:$0xff] %v539_v50  ;;  %587 = vst [vmem:[%s1090_s29 + $0xc8] sm:$0xff] %v555_v51  ;;  %v540_v57 = vmax.f32 %v466_v52, 0.0  ;;  %v556_v40 = vmax.f32 %v514_v53, 0.0  ;;  %v468_v58 = vadd.f32 %v467_v54, %v1081_v41  ;;  %v516_v59 = vadd.f32 %v515_v55, %v301_v44 }
  0xf5   : > { %v471_v60 = vpop.f32.mrf.mxu0  ;;  %v519_v61 = vpop.f32.mrf.mxu1 }
  0xf6   : > { %572 = vst [vmem:[%s1090_s29 + $0x50] sm:$0xff] %v540_v57  ;;  %588 = vst [vmem:[%s1090_s29 + $0xd0] sm:$0xff] %v556_v40  ;;  %v541_v62 = vmax.f32 %v468_v58, 0.0  ;;  %v557_v63 = vmax.f32 %v516_v59, 0.0  ;;  %v472_v0 = vadd.f32 %v471_v60, %v1083_v42  ;;  %v520_v1 = vadd.f32 %v519_v61, %v306_v56 }
  0xf7   : > { %v473_v2 = vpop.f32.mrf.mxu0  ;;  %v521_v3 = vpop.f32.mrf.mxu1 }
  0xf8   : > { %573 = vst [vmem:[%s1090_s29 + $0x58] sm:$0xff] %v541_v62  ;;  %589 = vst [vmem:[%s1090_s29 + $0xd8] sm:$0xff] %v557_v63  ;;  %v542_v41 = vmax.f32 %v472_v0, 0.0  ;;  %v558_v5 = vmax.f32 %v520_v1, 0.0  ;;  %v474_v6 = vadd.f32 %v473_v2, %v1083_v42  ;;  %v522_v7 = vadd.f32 %v521_v3, %v306_v56 }
  0xf9   : > { %v477_v8 = vpop.f32.mrf.mxu0  ;;  %v525_v9 = vpop.f32.mrf.mxu1 }
  0xfa   : > { %574 = vst [vmem:[%s1090_s29 + $0x60] sm:$0xff] %v542_v41  ;;  %590 = vst [vmem:[%s1090_s29 + $0xe0] sm:$0xff] %v558_v5  ;;  %v543_v10 = vmax.f32 %v474_v6, 0.0  ;;  %v559_v11 = vmax.f32 %v522_v7, 0.0  ;;  %v478_v12 = vadd.f32 %v477_v8, %v1086_v43  ;;  %v526_v13 = vadd.f32 %v525_v9, %v311_v4 }
  0xfb   : > { %v479_v14 = vpop.f32.mrf.mxu0  ;;  %v527_v15 = vpop.f32.mrf.mxu1 }
  0xfc   : > { %575 = vst [vmem:[%s1090_s29 + $0x68] sm:$0xff] %v543_v10  ;;  %591 = vst [vmem:[%s1090_s29 + $0xe8] sm:$0xff] %v559_v11  ;;  %v544_v42 = vmax.f32 %v478_v12, 0.0  ;;  %v560_v16 = vmax.f32 %v526_v13, 0.0  ;;  %v480_v17 = vadd.f32 %v479_v14, %v1086_v43  ;;  %v528_v18 = vadd.f32 %v527_v15, %v311_v4 }
  0xfe   : > { %576 = vst [vmem:[%s1090_s29 + $0x70] sm:$0xff] %v544_v42  ;;  %592 = vst [vmem:[%s1090_s29 + $0xf0] sm:$0xff] %v560_v16  ;;  %v545_v19 = vmax.f32 %v480_v17, 0.0  ;;  %v561_v20 = vmax.f32 %v528_v18, 0.0 }
 0x100   : > { %577 = vst [vmem:[%s1090_s29 + $0x78] sm:$0xff] %v545_v19  ;;  %593 = vst [vmem:[%s1090_s29 + $0xf8] sm:$0xff] %v561_v20 }
 0x101   : > { %799 = shalt.err (!%p796_p5)
}
 0x102   : > { %s800_s18 = scalar_lea.hbm %s1135_s7, 4096  ;;  %s804_s23 = scalar_lea.hbm %s1193_s3, 8192 }
 0x103   : > { %p801_p6 = scmp.ne.s32.totalorder %s1135_s7, %s800_s18  ;;  %p805_p10 = scmp.lt.s32.totalorder %s1135_s7, %s1193_s3 }
 0x104   : > { %p806_p11 = scmp.lt.s32.totalorder %s804_s23, %s800_s18 }
 0x105   : > { %p802_p7 = pnand %p801_p6, %p929_p4 }
 0x106   : > { %p807_p12 = por %p806_p11, %p805_p10 }
 0x107   : > { %p803_p9 = pneg %p802_p7 }
 0x109   : > { %p808_p13 = pnand %p807_p12, %p803_p9 }
 0x10b   : > { %811 = shalt.err (!%p808_p13)
}
 0x10c   : > { %s867_s28 = smov 256   ;;  %s868_s29 = smov 16  }
 0x10d   : > { %724 = dma.vmem_to_hbm [thread:$0]  (%p929_p4), %s1137_s4, 4096, %s1135_s7, %s1145_s15, %s867_s28, %s867_s28, %s868_s29  }
 0x10e PF: > { %p730_p0 = scmp.ge.s32.totalorder %s862_s17, 2  ;;  %s625_s30 = sand.u32 1, %s842_s12  }
 0x10f   : > { %s626_s5 = scalar_lea.sflag [#allocation3], %s625_s30 }
 0x110   : > { %p727_p1 = pnand %p730_p0, %p936_p8 }
 0x112   : > { %p728_p2 = pneg %p727_p1 }
 0x114   : > { %837 = dma.done.wait (%p728_p2), %s626_s5, 4096  }
 0x115   : > { %839 = vsyncadd (%p728_p2), %s626_s5, 4294963200  ;;  %s16_s17 = sadd.s32 1, %s862_s17   ;;  %s1196_s12 = smov %s846_s13 }
 0x116   : > { %p13_p3 = scmp.ge.s32.totalorder %s16_s17, 4   ;;  %s1197_s13 = smov %s850_s14 }
 0x117   : > { %s1198_s14 = smov %s942_s25  ;;  %s1199_s15 = smov %s858_s16 }
 0x118   : > { %s1200_s16 = smov %s1202_s20  ;;  %15 = sbr.rel (!%p13_p3) target bundleno = 4 (0x4), region = 67 }
 0x11d   :  { %631 = vsyncpa [#allocation3], 1 }
 0x11e   :  { %633 = vsyncpa [#allocation3 + $0x1], 1 }

</bundles_post_ra>
